<compile_context>
chip_gen: v6e
topology: v6e:2x2x1
jax: 0.10.0
libtpu: 0.0.40
codegen_flags: <defaults>
</compile_context>

<pallas_src>
import jax
import jax.numpy as jnp
from jax.experimental import pallas as pl
from jax.experimental.pallas import tpu as pltpu


def fair_autoencoder_kernel(
    xT_ref,
    w_e1_ref, b_e1_ref, w_e2_ref, b_e2_ref,
    w_d1_ref, b_d1_ref, w_d2_ref, b_d2_ref,
    encT_ref, decT_ref,
):
    # Transposed layout: features on sublanes, batch on lanes (lane-dense
    # loads *and* stores).  4 MXU matmuls with N = TB; bias/ReLU on the VPU.
    xT = xT_ref[...]                                                     # (D, TB)

    # Encoder: h = ReLU(W_e1 @ x^T + b_e1);  enc = W_e2 @ h + b_e2
    h = jnp.dot(w_e1_ref[...], xT, preferred_element_type=jnp.float32)   # (H, TB)
    h = jnp.maximum(h + b_e1_ref[...], 0.0)
    enc = jnp.dot(w_e2_ref[...], h, preferred_element_type=jnp.float32)  # (E, TB)
    enc = enc + b_e2_ref[...]

    # Decoder: g = ReLU(W_d1 @ enc + b_d1); dec = W_d2 @ g + b_d2
    g = jnp.dot(w_d1_ref[...], enc, preferred_element_type=jnp.float32)  # (H, TB)
    g = jnp.maximum(g + b_d1_ref[...], 0.0)
    dec = jnp.dot(w_d2_ref[...], g, preferred_element_type=jnp.float32)  # (D, TB)
    dec = dec + b_d2_ref[...]

    encT_ref[...] = enc.astype(encT_ref.dtype)
    decT_ref[...] = dec.astype(decT_ref.dtype)


def _round_up(n, m):
    return ((n + m - 1) // m) * m


def _vmem_budget_bytes():
    """Generation-aware VMEM budget (also used as vmem_limit_bytes).
    v7x: 64 MiB/TC -> ~35 MiB budget; v5e/v6e: 128 MiB -> ~70 MiB budget."""
    try:
        cap = int(pltpu.get_tpu_info().vmem_capacity_bytes)
    except Exception:
        cap = 64 << 20  # smallest per-TC capacity across v5e/v6e/v7x
    return max(16 << 20, int(cap * 0.55))


def _pick_batch_tile(B, D, E, H, budget_bytes, max_tile=8192):
    """Largest batch tile (multiple of 128, <= max_tile, <= padded B) whose
    full VMEM footprint fits the budget.  Accounts for double-buffered
    xT/encT/decT tiles, double-buffered weights & biases (padded to (8,128)
    VMEM tiles), live intermediates, and fixed slack."""
    def rup(n, m):
        return _round_up(n, m)

    b128 = rup(B, 128)
    tb = min(rup(max_tile, 128), b128)

    def need(t):
        # Streamed, double-buffered per-tile slabs (f32).
        stream = 2 * 4 * t * (rup(D, 8) + rup(D, 8) + rup(E, 8))      # xT, decT, encT
        # Live intermediates in the body (h, g, enc, dec values).
        interm = 4 * t * (2 * rup(H, 8) + rup(E, 8) + rup(D, 8))
        # Grid-invariant weights/biases (default pipeline double-buffers them).
        weights = 2 * 4 * (rup(H, 8) * rup(D, 128) + rup(E, 8) * rup(H, 128)
                           + rup(H, 8) * rup(E, 128) + rup(D, 8) * rup(H, 128))
        biases = 2 * 4 * 128 * (2 * rup(H, 8) + rup(E, 8) + rup(D, 8))
        slack = 2 << 20
        return stream + interm + weights + biases + slack

    while tb > 128 and need(tb) > budget_bytes:
        tb = rup(tb // 2, 128)
    return max(tb, 128)


def fair_autoencoder_forward(x, params, tb=None, core_parallel=False):
    """x: (B, D) float32.  params: torch-layout weights, i.e. w_* of shape
    (out_features, in_features) and b_* of shape (out_features,).
    Returns (encoded (B, E), decoded (B, D)), both float32."""
    w_e1, b_e1 = params["w_e1"], params["b_e1"]
    w_e2, b_e2 = params["w_e2"], params["b_e2"]
    w_d1, b_d1 = params["w_d1"], params["b_d1"]
    w_d2, b_d2 = params["w_d2"], params["b_d2"]

    B, D = x.shape
    H = w_e1.shape[0]        # 32
    E = w_e2.shape[0]        # encoded_dim

    budget = _vmem_budget_bytes()
    if tb is None:
        tb = _pick_batch_tile(B, D, E, H, budget)
    tb = max(128, _round_up(min(tb, _round_up(B, 128)), 128))
    b_pad = _round_up(B, tb)
    num_tiles = b_pad // tb

    # Wrapper-side layout plumbing: pad the batch and present a lane-dense
    # (features x batch) slab to the kernel.
    x_p = x if b_pad == B else jnp.pad(x, ((0, b_pad - B), (0, 0)))
    xT = x_p.T                                   # (D, b_pad)

    # Biases as column vectors so they broadcast across the lane (batch) axis.
    b_e1c = b_e1.reshape(H, 1)
    b_e2c = b_e2.reshape(E, 1)
    b_d1c = b_d1.reshape(H, 1)
    b_d2c = b_d2.reshape(D, 1)

    flops = 2 * b_pad * (D * H + H * E + E * H + H * D)
    bytes_accessed = 4 * (b_pad * D            # x in
                          + b_pad * E + b_pad * D   # outputs
                          + 2 * (D * H + H * E)     # encoder params (w + transposes are noise)
                          + 2 * (E * H + H * D)
                          + 2 * H + E + D)
    cost = pl.CostEstimate(flops=flops, transcendentals=0,
                           bytes_accessed=bytes_accessed)

    # On v7x set core_parallel=True so both TensorCores split the batch grid
    # (CORE_PARALLEL actually changes codegen; "parallel" is a near no-op).
    dim_sem = (pltpu.CORE_PARALLEL,) if core_parallel else ("parallel",)

    grid_spec = pl.GridSpec(
        grid=(num_tiles,),
        in_specs=[
            pl.BlockSpec((D, tb), lambda i: (0, i)),   # x^T: streamed per tile
            pl.BlockSpec((H, D), lambda i: (0, 0)),    # weights / biases:
            pl.BlockSpec((H, 1), lambda i: (0, 0)),    #   VMEM-resident across
            pl.BlockSpec((E, H), lambda i: (0, 0)),    #   all grid steps
            pl.BlockSpec((E, 1), lambda i: (0, 0)),
            pl.BlockSpec((H, E), lambda i: (0, 0)),
            pl.BlockSpec((H, 1), lambda i: (0, 0)),
            pl.BlockSpec((D, H), lambda i: (0, 0)),
            pl.BlockSpec((D, 1), lambda i: (0, 0)),
        ],
        out_specs=(
            pl.BlockSpec((E, tb), lambda i: (0, i)),   # encoded^T (lane-dense)
            pl.BlockSpec((D, tb), lambda i: (0, i)),   # decoded^T (lane-dense)
        ),
    )

    encT, decT = pl.pallas_call(
        fair_autoencoder_kernel,
        out_shape=(
            jax.ShapeDtypeStruct((E, b_pad), jnp.float32),
            jax.ShapeDtypeStruct((D, b_pad), jnp.float32),
        ),
        grid_spec=grid_spec,
        compiler_params=pltpu.CompilerParams(
            dimension_semantics=dim_sem,
            vmem_limit_bytes=budget,
        ),
        cost_estimate=cost,
    )(xT, w_e1, b_e1c, w_e2, b_e2c, w_d1, b_d1c, w_d2, b_d2c)

    encoded = encT[:, :B].T                      # (B, E)
    decoded = decT[:, :B].T                      # (B, D)
    return encoded, decoded


def init_params(key, input_dim, encoded_dim=8, hidden=32):
    """Deterministic synthetic init mirroring torch.nn.Linear defaults
    (uniform with bound 1/sqrt(fan_in)), torch layout W: (out, in), b: (out,)."""
    ks = jax.random.split(key, 8)

    def linear(kw, kb, fan_in, fan_out):
        bound = 1.0 / (fan_in ** 0.5)
        w = jax.random.uniform(kw, (fan_out, fan_in), jnp.float32, -bound, bound)
        b = jax.random.uniform(kb, (fan_out,), jnp.float32, -bound, bound)
        return w, b

    w_e1, b_e1 = linear(ks[0], ks[1], input_dim, hidden)
    w_e2, b_e2 = linear(ks[2], ks[3], hidden, encoded_dim)
    w_d1, b_d1 = linear(ks[4], ks[5], encoded_dim, hidden)
    w_d2, b_d2 = linear(ks[6], ks[7], hidden, input_dim)
    return dict(w_e1=w_e1, b_e1=b_e1, w_e2=w_e2, b_e2=b_e2,
                w_d1=w_d1, b_d1=b_d1, w_d2=w_d2, b_d2=b_d2)


if __name__ == "__main__":
    key = jax.random.PRNGKey(0)
    kx, kp = jax.random.split(key)

    # batch=200 is NOT a multiple of 128: exercises the pad/slice path.
    # tb=128 -> padded batch 256, grid=(2,), so the pipelined path runs even
    # at this small test size.  (Omit tb for auto, generation-aware sizing.)
    batch, input_dim, encoded_dim = 200, 32, 8
    x = jax.random.normal(kx, (batch, input_dim), jnp.float32)
    params = init_params(kp, input_dim, encoded_dim)

    encoded, decoded = fair_autoencoder_forward(x, params, tb=128)
    jax.block_until_ready((encoded, decoded))

    # Pure-JAX reference of the same forward pass (torch layout: x @ W.T + b).
    h = jnp.maximum(x @ params["w_e1"].T + params["b_e1"], 0.0)
    enc_ref = h @ params["w_e2"].T + params["b_e2"]
    g = jnp.maximum(enc_ref @ params["w_d1"].T + params["b_d1"], 0.0)
    dec_ref = g @ params["w_d2"].T + params["b_d2"]

    assert encoded.shape == (batch, encoded_dim)
    assert decoded.shape == (batch, input_dim)
    assert jnp.allclose(encoded, enc_ref, atol=1e-5), "encoded mismatch vs reference"
    assert jnp.allclose(decoded, dec_ref, atol=1e-5), "decoded mismatch vs reference"

    print("KERNEL_OK")
</pallas_src>

<mosaic_0001>
module attributes {stable_mosaic.version = 11 : i64} {
  func.func @fair_autoencoder_kernel(%arg0: i32, %arg1: memref<32x128xf32, #tpu.memory_space<vmem>>, %arg2: memref<32x32xf32, #tpu.memory_space<vmem>>, %arg3: memref<32x1xf32, #tpu.memory_space<vmem>>, %arg4: memref<8x32xf32, #tpu.memory_space<vmem>>, %arg5: memref<8x1xf32, #tpu.memory_space<vmem>>, %arg6: memref<32x8xf32, #tpu.memory_space<vmem>>, %arg7: memref<32x1xf32, #tpu.memory_space<vmem>>, %arg8: memref<32x32xf32, #tpu.memory_space<vmem>>, %arg9: memref<32x1xf32, #tpu.memory_space<vmem>>, %arg10: memref<8x128xf32, #tpu.memory_space<vmem>>, %arg11: memref<32x128xf32, #tpu.memory_space<vmem>>) attributes {dimension_semantics = [#tpu.dimension_semantics<parallel>], iteration_bounds = array<i64: 2>, scalar_prefetch = 0 : i64, scratch_operands = 0 : i64, tpu.core_type = #tpu.core_type<tc>, window_params = [{transform_indices = @transform_0, window_bounds = array<i64: 32, 128>}, {pipeline_mode = #tpu.pipeline_mode<synchronous>, transform_indices = @transform_1, window_bounds = array<i64: 32, 32>}, {pipeline_mode = #tpu.pipeline_mode<synchronous>, transform_indices = @transform_2, window_bounds = array<i64: 32, 1>}, {pipeline_mode = #tpu.pipeline_mode<synchronous>, transform_indices = @transform_3, window_bounds = array<i64: 8, 32>}, {pipeline_mode = #tpu.pipeline_mode<synchronous>, transform_indices = @transform_4, window_bounds = array<i64: 8, 1>}, {pipeline_mode = #tpu.pipeline_mode<synchronous>, transform_indices = @transform_5, window_bounds = array<i64: 32, 8>}, {pipeline_mode = #tpu.pipeline_mode<synchronous>, transform_indices = @transform_6, window_bounds = array<i64: 32, 1>}, {pipeline_mode = #tpu.pipeline_mode<synchronous>, transform_indices = @transform_7, window_bounds = array<i64: 32, 32>}, {pipeline_mode = #tpu.pipeline_mode<synchronous>, transform_indices = @transform_8, window_bounds = array<i64: 32, 1>}, {transform_indices = @transform_9, window_bounds = array<i64: 8, 128>}, {transform_indices = @transform_10, window_bounds = array<i64: 32, 128>}]} {
    %c0 = arith.constant 0 : index
    %c0_0 = arith.constant 0 : index
    %0 = vector.load %arg1[%c0, %c0_0] : memref<32x128xf32, #tpu.memory_space<vmem>>, vector<32x128xf32>
    %c0_1 = arith.constant 0 : index
    %c0_2 = arith.constant 0 : index
    %1 = vector.load %arg2[%c0_1, %c0_2] : memref<32x32xf32, #tpu.memory_space<vmem>>, vector<32x32xf32>
    %cst = arith.constant dense<0.000000e+00> : vector<32x128xf32>
    %2 = tpu.matmul %1, %0, %cst {dimension_numbers = #tpu.dot_dimension_numbers<[1], [0], [0], [1], [0, 0, 1, 1], [], []>} : vector<32x32xf32>, vector<32x128xf32>, vector<32x128xf32> -> vector<32x128xf32>
    %c0_3 = arith.constant 0 : index
    %c0_4 = arith.constant 0 : index
    %3 = vector.load %arg3[%c0_3, %c0_4] : memref<32x1xf32, #tpu.memory_space<vmem>>, vector<32x1xf32>
    %4 = vector.broadcast %3 : vector<32x1xf32> to vector<32x128xf32>
    %5 = arith.addf %2, %4 : vector<32x128xf32>
    %cst_5 = arith.constant 0.000000e+00 : f32
    %6 = vector.broadcast %cst_5 : f32 to vector<32x128xf32>
    %7 = arith.maximumf %5, %6 : vector<32x128xf32>
    %c0_6 = arith.constant 0 : index
    %c0_7 = arith.constant 0 : index
    %8 = vector.load %arg4[%c0_6, %c0_7] : memref<8x32xf32, #tpu.memory_space<vmem>>, vector<8x32xf32>
    %cst_8 = arith.constant dense<0.000000e+00> : vector<8x128xf32>
    %9 = tpu.matmul %8, %7, %cst_8 {dimension_numbers = #tpu.dot_dimension_numbers<[1], [0], [0], [1], [0, 0, 1, 1], [], []>} : vector<8x32xf32>, vector<32x128xf32>, vector<8x128xf32> -> vector<8x128xf32>
    %c0_9 = arith.constant 0 : index
    %c0_10 = arith.constant 0 : index
    %10 = vector.load %arg5[%c0_9, %c0_10] : memref<8x1xf32, #tpu.memory_space<vmem>>, vector<8x1xf32>
    %11 = vector.broadcast %10 : vector<8x1xf32> to vector<8x128xf32>
    %12 = arith.addf %9, %11 : vector<8x128xf32>
    %c0_11 = arith.constant 0 : index
    %c0_12 = arith.constant 0 : index
    %13 = vector.load %arg6[%c0_11, %c0_12] : memref<32x8xf32, #tpu.memory_space<vmem>>, vector<32x8xf32>
    %cst_13 = arith.constant dense<0.000000e+00> : vector<32x128xf32>
    %14 = tpu.matmul %13, %12, %cst_13 {dimension_numbers = #tpu.dot_dimension_numbers<[1], [0], [0], [1], [0, 0, 1, 1], [], []>} : vector<32x8xf32>, vector<8x128xf32>, vector<32x128xf32> -> vector<32x128xf32>
    %c0_14 = arith.constant 0 : index
    %c0_15 = arith.constant 0 : index
    %15 = vector.load %arg7[%c0_14, %c0_15] : memref<32x1xf32, #tpu.memory_space<vmem>>, vector<32x1xf32>
    %16 = vector.broadcast %15 : vector<32x1xf32> to vector<32x128xf32>
    %17 = arith.addf %14, %16 : vector<32x128xf32>
    %cst_16 = arith.constant 0.000000e+00 : f32
    %18 = vector.broadcast %cst_16 : f32 to vector<32x128xf32>
    %19 = arith.maximumf %17, %18 : vector<32x128xf32>
    %c0_17 = arith.constant 0 : index
    %c0_18 = arith.constant 0 : index
    %20 = vector.load %arg8[%c0_17, %c0_18] : memref<32x32xf32, #tpu.memory_space<vmem>>, vector<32x32xf32>
    %cst_19 = arith.constant dense<0.000000e+00> : vector<32x128xf32>
    %21 = tpu.matmul %20, %19, %cst_19 {dimension_numbers = #tpu.dot_dimension_numbers<[1], [0], [0], [1], [0, 0, 1, 1], [], []>} : vector<32x32xf32>, vector<32x128xf32>, vector<32x128xf32> -> vector<32x128xf32>
    %c0_20 = arith.constant 0 : index
    %c0_21 = arith.constant 0 : index
    %22 = vector.load %arg9[%c0_20, %c0_21] : memref<32x1xf32, #tpu.memory_space<vmem>>, vector<32x1xf32>
    %23 = vector.broadcast %22 : vector<32x1xf32> to vector<32x128xf32>
    %24 = arith.addf %21, %23 : vector<32x128xf32>
    %c0_22 = arith.constant 0 : index
    %c0_23 = arith.constant 0 : index
    %25 = vector.load %arg10[%c0_22, %c0_23] : memref<8x128xf32, #tpu.memory_space<vmem>>, vector<8x128xf32>
    tpu.vector_store %arg10[%c0_22, %c0_23], %12 {strides = array<i32>} : memref<8x128xf32, #tpu.memory_space<vmem>>, vector<8x128xf32>,
    %c0_24 = arith.constant 0 : index
    %c0_25 = arith.constant 0 : index
    %26 = vector.load %arg11[%c0_24, %c0_25] : memref<32x128xf32, #tpu.memory_space<vmem>>, vector<32x128xf32>
    tpu.vector_store %arg11[%c0_24, %c0_25], %24 {strides = array<i32>} : memref<32x128xf32, #tpu.memory_space<vmem>>, vector<32x128xf32>,
    return
  }
  func.func @transform_0(%arg0: i32) -> (i32, i32) {
    %c0_i32 = arith.constant 0 : i32
    %c0_i32_0 = arith.constant 0 : i32
    return %c0_i32, %arg0 : i32, i32
  }
  func.func @transform_1(%arg0: i32) -> (i32, i32) {
    %c0_i32 = arith.constant 0 : i32
    %c0_i32_0 = arith.constant 0 : i32
    %c0_i32_1 = arith.constant 0 : i32
    return %c0_i32, %c0_i32_0 : i32, i32
  }
  func.func @transform_2(%arg0: i32) -> (i32, i32) {
    %c0_i32 = arith.constant 0 : i32
    %c0_i32_0 = arith.constant 0 : i32
    %c0_i32_1 = arith.constant 0 : i32
    return %c0_i32, %c0_i32_0 : i32, i32
  }
  func.func @transform_3(%arg0: i32) -> (i32, i32) {
    %c0_i32 = arith.constant 0 : i32
    %c0_i32_0 = arith.constant 0 : i32
    %c0_i32_1 = arith.constant 0 : i32
    return %c0_i32, %c0_i32_0 : i32, i32
  }
  func.func @transform_4(%arg0: i32) -> (i32, i32) {
    %c0_i32 = arith.constant 0 : i32
    %c0_i32_0 = arith.constant 0 : i32
    %c0_i32_1 = arith.constant 0 : i32
    return %c0_i32, %c0_i32_0 : i32, i32
  }
  func.func @transform_5(%arg0: i32) -> (i32, i32) {
    %c0_i32 = arith.constant 0 : i32
    %c0_i32_0 = arith.constant 0 : i32
    %c0_i32_1 = arith.constant 0 : i32
    return %c0_i32, %c0_i32_0 : i32, i32
  }
  func.func @transform_6(%arg0: i32) -> (i32, i32) {
    %c0_i32 = arith.constant 0 : i32
    %c0_i32_0 = arith.constant 0 : i32
    %c0_i32_1 = arith.constant 0 : i32
    return %c0_i32, %c0_i32_0 : i32, i32
  }
  func.func @transform_7(%arg0: i32) -> (i32, i32) {
    %c0_i32 = arith.constant 0 : i32
    %c0_i32_0 = arith.constant 0 : i32
    %c0_i32_1 = arith.constant 0 : i32
    return %c0_i32, %c0_i32_0 : i32, i32
  }
  func.func @transform_8(%arg0: i32) -> (i32, i32) {
    %c0_i32 = arith.constant 0 : i32
    %c0_i32_0 = arith.constant 0 : i32
    %c0_i32_1 = arith.constant 0 : i32
    return %c0_i32, %c0_i32_0 : i32, i32
  }
  func.func @transform_9(%arg0: i32) -> (i32, i32) {
    %c0_i32 = arith.constant 0 : i32
    %c0_i32_0 = arith.constant 0 : i32
    return %c0_i32, %arg0 : i32, i32
  }
  func.func @transform_10(%arg0: i32) -> (i32, i32) {
    %c0_i32 = arith.constant 0 : i32
    %c0_i32_0 = arith.constant 0 : i32
    return %c0_i32, %arg0 : i32, i32
  }
}

</mosaic_0001>

<bundles_post_ra>
// kernel: tpu_custom_call.1
= control target key start
LH: loop header
LB: loop body
LE: loop exit
PB: predicated region body
PF: predicated region fallthrough
CT: control target
= control target key end

     0   :  { %s1559_s0 = inlined_call_operand.vmem [shape: f32[32,256], index: 0, kind: input, shape index: {}]   ;;  %s1560_s1 = inlined_call_operand.vmem [shape: f32[32,32], index: 1, kind: input, shape index: {}]   ;;  %s1561_s2 = inlined_call_operand.vmem [shape: f32[32,1], index: 2, kind: input, shape index: {}]   ;;  %s1562_s3 = inlined_call_operand.vmem [shape: f32[8,32], index: 3, kind: input, shape index: {}]   ;;  %s1563_s4 = inlined_call_operand.vmem [shape: f32[8,1], index: 4, kind: input, shape index: {}]   ;;  %s1564_s5 = inlined_call_operand.vmem [shape: f32[32,8], index: 5, kind: input, shape index: {}]   ;;  %s1565_s6 = inlined_call_operand.vmem [shape: f32[32,1], index: 6, kind: input, shape index: {}]   ;;  %s1566_s7 = inlined_call_operand.vmem [shape: f32[32,32], index: 7, kind: input, shape index: {}]   ;;  %s1567_s8 = inlined_call_operand.vmem [shape: f32[32,1], index: 8, kind: input, shape index: {}]   ;;  %s1568_s9 = inlined_call_operand.hbm [shape: f32[8,256], index: 9, kind: output, shape index: {0}]   ;;  %s1569_s10 = inlined_call_operand.hbm [shape: f32[32,256], index: 10, kind: output, shape index: {1}]  }
   0x1   :  { %1572 = sst [smem:[#allocation9_spill]] %s1559_s0 }
   0x2   :  { %1573 = sst [smem:[#allocation10_spill]] %s1560_s1 }
   0x3   :  { %1574 = sst [smem:[#allocation11_spill]] %s1561_s2 }
   0x4   :  { %16 = vsyncpa [#allocation4], 0 }
   0x5   :  { %18 = vsyncpa [#allocation4 + $0x1], 0 }
   0x6   :  { %19 = vsyncpa [#allocation6], 0 }
   0x7   :  { %21 = vsyncpa [#allocation6 + $0x1], 0  ;;  %s1329_s13 = smov 0   ;;  %s1331_s14 = smov 0  }
   0x8   :  { %s1333_s15 = smov 0   ;;  %s1335_s16 = smov 0  }
   0x9 LB: > { %s1020_s17 = sadd.s32 4294967295, %s1264_s16   ;;  %s1021_s18 = sadd.s32 4294967294, %s1264_s16   ;;  %s1264_s16 = sphi %s1335_s16, %s1585_s16   ;;  %s1260_s15 = sphi %s1333_s15, %s1584_s15   ;;  %s1256_s14 = sphi %s1331_s14, %s1583_s14   ;;  %s1252_s13 = sphi %s1329_s13, %s1582_s13  }
   0xa   : > { %s1352_s19 = sadd.s32 1, %s1264_s16   ;;  %s34_s20 = sadd.s32 1, %s1260_s15 }
   0xb   : > { %s31_s21 = ssub.s32 %s1264_s16, %s1352_s19  ;;  %p41_p0 = scmp.ne.s32.totalorder %s1260_s15, %s1256_s14 }
   0xc   : > { %p32_p1 = scmp.eq.s32.totalorder %s31_s21, 0  ;;  %p42_p2 = scmp.eq.s32.totalorder %s1264_s16, 0 }
   0xd   : > { %p239_p3 = scmp.eq.s32.totalorder %s1020_s17, 1  ;;  %p244_p4 = scmp.ne.s32.totalorder %s1256_s14, %s1252_s13 }
   0xe   : > { %s1365_s22 = scalar_select %p32_p1, %s1260_s15, %s34_s20  }
   0xf   : > { %p43_p5 = por %p42_p2, %p41_p0  ;;  %p1367_p6 = por %p239_p3, %p41_p0 }
  0x10   : > { %p245_p7 = scmp.eq.s32.totalorder %s1021_s18, 1  ;;  %p1571_p9 = scmp.ge.s32.totalorder %s1264_s16, 2 }
  0x12   : > { %p1371_p8 = por %p245_p7, %p244_p4  ;;  %311 = sbr.rel (%p1571_p9) target bundleno = 35 (0x23), region = 48 }
  0x17   : > { %314 = sbr.rel (!%p43_p5) target bundleno = 35 (0x23), region = 52  ;;  %s316_s25 = sand.u32 (%p43_p5), 1, %s1260_s15  }
  0x18   : > { %s1025_s26 = sshll.u32 (%p43_p5), %s1264_s16, 3  ;;  %s1024_s27 = sshll.u32 (%p43_p5), %s316_s25, 5 }
  0x19   : > { %s1577_s0 = sld [smem:[#allocation9_spill]] (%p43_p5)  ;;  %s318_s11 = scalar_lea.vmem (%p43_p5), [#allocation2], %s1024_s27 }
  0x1f   : > { %s320_s30 = scalar_lea.vmem %s1577_s0, %s1025_s26 }
  0x20   : > { %v355_v0 = vld [vmem:[%s320_s30] sm:$0xff]  ;;  %v357_v1 = vld [vmem:[%s320_s30 + $0x10] sm:$0xff] }
  0x21   : > { %v359_v2 = vld [vmem:[%s320_s30 + $0x20] sm:$0xff]  ;;  %356 = vst [vmem:[%s318_s11] sm:$0xff] %v355_v0  ;;  %358 = vst [vmem:[%s318_s11 + $0x8] sm:$0xff] %v357_v1  ;;  %v361_v3 = vld [vmem:[%s320_s30 + $0x30] sm:$0xff] }
  0x22   : > { %360 = vst [vmem:[%s318_s11 + $0x10] sm:$0xff] %v359_v2  ;;  %362 = vst [vmem:[%s318_s11 + $0x18] sm:$0xff] %v361_v3 }
  0x23 PF: > { %p1026_p10 = scmp.ge.s32.totalorder %s1264_s16, 1  ;;  %p367_p11 = scmp.lt.s32.totalorder %s1264_s16, 3 }
  0x25   : > { %p368_p12 = pnand %p1026_p10, %p367_p11 }
  0x26   : > { %s1386_s12 = sand.u32 (!%p368_p12), 1, %s1256_s14   ;;  %s1578_s1 = sld [smem:[#allocation10_spill]] (!%p368_p12) }
  0x27   : > { %371 = sbr.rel (%p368_p12) target bundleno = 886 (0x376), region = 90  ;;  %s1570_s21 = sshll.u32 (!%p368_p12), %s1386_s12, 5 }
  0x28   : > { %s1579_s2 = sld [smem:[#allocation11_spill]] (!%p368_p12)  ;;  %s376_s29 = scalar_lea.vmem (!%p368_p12), [#allocation2], %s1570_s21 }
  0x29   : > { %s1028_s26 = sshll.u32 (!%p368_p12), %s1386_s12, 3  ;;  %s1488_s25 = sshll.u32 (!%p368_p12), %s1020_s17, 7 }
  0x2a   : > { %s1461_s18 = scalar_lea.vmem (!%p368_p12), [#allocation3], %s1028_s26  ;;  %s907_s30 = scalar_lea.hbm (!%p368_p12), %s1568_s9, %s1488_s25 }
  0x2b   : > { %s909_s27 = sshll.u32 (!%p368_p12), %s1461_s18, 4  ;;  %s891_s11 = scalar_lea.sflag (!%p368_p12), [#allocation4], %s1386_s12  ;;  %s910_s27 = int_to_ptr.vmem [resolvable:$true] %s909_s27 }
  0x2c   : > { %v420_v4 = vld [vmem:[%s1578_s1] sm:$0xff]  ;;  %vm448_vm0 = vcmask 261120   ;;  %v1266_v5 = vmov 0   ;;  %v419_v8 = vld [vmem:[%s376_s29 + $0x18] sm:$0xff]  ;;  %v418_v9 = vld [vmem:[%s376_s29 + $0x10] sm:$0xff]  ;;  %v1267_v26 = vmov 0.0  }
  0x2d   : > { %1083 = vmatprep.mubr.msk.f32.mxu0 %vm448_vm0, %v420_v4  ;;  %1172 = vset.pattern.permute.xlu0 %v1266_v5  ;;  %v417_v12 = vld [vmem:[%s376_s29 + $0x8] sm:$0xff]  ;;  %v416_v13 = vld [vmem:[%s376_s29] sm:$0xff]  ;;  %v637_v15 = vld [vmem:[%s1565_s6 + $0x18] sm:$0xff]  ;;  %vm1268_vm1 = vmmov 0   ;;  %vm658_vm2 = vcmask 64512   ;;  %s1174_s21 = scalar_lea.vmem %s910_s27, 128 }
  0x2e   : > { %v427_v6 = vld [vmem:[%s1579_s2 + $0x18] sm:$0xff]  ;;  %1173 = vset.pattern.permute.xlu1 %v1266_v5  ;;  %v425_v7 = vld [vmem:[%s1579_s2 + $0x8] sm:$0xff]  ;;  %v426_v10 = vld [vmem:[%s1579_s2 + $0x10] sm:$0xff]  ;;  %1075 = vmatprep.subr.mxu0 %v419_v8  ;;  %p1175_p13 = scmp.ne.s32.totalorder %s910_s27, %s1174_s21  ;;  %s1269_s20 = smov [#allocation3]  }
  0x2f   : > { %445 = vperm.xlu0 %1172, %v427_v6   ;;  %435 = vperm.xlu1 %1173, %v425_v7   ;;  %v424_v11 = vld [vmem:[%s1579_s2] sm:$0xff]  ;;  %v421_v16 = vld [vmem:[%s1578_s1 + $0x8] sm:$0xff]  ;;  %v422_v17 = vld [vmem:[%s1578_s1 + $0x10] sm:$0xff]  ;;  %s1178_s29 = sshll.u32 %s1269_s20, 4  ;;  %s1179_s29 = int_to_ptr.vmem [resolvable:$false] %s1178_s29 }
  0x30   : > { %1076 = vmatpush3.msra.mxu0 %v419_v8  ;;  %v551_v14 = vld [vmem:[%s1563_s4] sm:$0xff]  ;;  %v636_v18 = vld [vmem:[%s1565_s6 + $0x10] sm:$0xff]  ;;  %v635_v19 = vld [vmem:[%s1565_s6 + $0x8] sm:$0xff]  ;;  %1089 = vmatprep.subr.mxu1 %v1267_v26  ;;  %p1176_p0 = pnand %p1175_p13, %p1367_p6  ;;  %s1180_s0 = scalar_lea.vmem %s1179_s29, 256 }
  0x31   : > { %1077 = vmatprep.subr.mxu0 %v418_v9  ;;  %v423_v20 = vld [vmem:[%s1578_s1 + $0x18] sm:$0xff]  ;;  %v634_v21 = vld [vmem:[%s1565_s6] sm:$0xff]  ;;  %v765_v23 = vld [vmem:[%s1567_s8 + $0x8] sm:$0xff]  ;;  %1097 = vmatprep.mubr.msk.f32.mxu1 %vm1268_vm1, %v1267_v26  ;;  %p1181_p2 = scmp.lt.s32.totalorder %s910_s27, %s1179_s29  ;;  %p1182_p3 = scmp.lt.s32.totalorder %s1180_s0, %s1174_s21 }
  0x32   : > { %1078 = vmatpush3.msra.mxu0 %v418_v9  ;;  %v764_v22 = vld [vmem:[%s1567_s8] sm:$0xff]  ;;  %v766_v24 = vld [vmem:[%s1567_s8 + $0x10] sm:$0xff]  ;;  %v767_v25 = vld [vmem:[%s1567_s8 + $0x18] sm:$0xff]  ;;  %p1177_p1 = pneg %p1176_p0 }
  0x33   : > { %440 = vperm.xlu0 %1172, %v426_v10   ;;  %430 = vperm.xlu1 %1173, %v424_v11   ;;  %v550_v43 = vld [vmem:[%s1562_s3] sm:$0xff]  ;;  %v631_v49 = vld [vmem:[%s1564_s5 + $0x8] sm:$0xff]  ;;  %v632_v50 = vld [vmem:[%s1564_s5 + $0x10] sm:$0xff]  ;;  %p1183_p4 = por %p1182_p3, %p1181_p2 }
  0x34   : > { %1079 = vmatprep.subr.mxu0 %v417_v12  ;;  %v630_v44 = vld [vmem:[%s1564_s5] sm:$0xff]  ;;  %v633_v51 = vld [vmem:[%s1564_s5 + $0x18] sm:$0xff]  ;;  %v761_v5 = vld [vmem:[%s1566_s7 + $0x8] sm:$0xff] }
  0x35   : > { %1080 = vmatpush3.msra.mxu0 %v417_v12  ;;  %v760_v52 = vld [vmem:[%s1566_s7] sm:$0xff]  ;;  %v762_v6 = vld [vmem:[%s1566_s7 + $0x10] sm:$0xff]  ;;  %v763_v7 = vld [vmem:[%s1566_s7 + $0x18] sm:$0xff]  ;;  %p1184_p5 = pnand %p1183_p4, %p1177_p1 }
  0x36   : > { %1081 = vmatprep.subr.mxu0 %v416_v13 }
  0x37   : > { %554 = vperm.xlu0 %1172, %v551_v14   ;;  %1082 = vmatpush3.msra.mxu0 %v416_v13 }
  0x38   : > { %655 = vperm.xlu1 %1173, %v637_v15   ;;  %1084 = vmatmul.mubr.msk.f32.vlgmr.msra.gmra.mxu0 %vm448_vm0, %v421_v16 }
  0x39   : > { %1086 = vmatprep.mubr.msk.f32.mxu0 %vm448_vm0, %v422_v17 }
  0x3b   : > { %650 = vperm.xlu0 %1172, %v636_v18  }
  0x3c   : > { %645 = vperm.xlu1 %1173, %v635_v19   ;;  %1087 = vmatmul.mubr.msk.f32.gmra.mxu0 %vm448_vm0, %v423_v20 }
  0x3d   : > { %1116 = vmatprep.mubr.msk.f32.mxu0 %vm448_vm0, %v760_v52 }
  0x3f   : > { %640 = vperm.xlu0 %1172, %v634_v21  }
  0x40   : > { %770 = vperm.xlu1 %1173, %v764_v22  }
  0x43   : > { %775 = vperm.xlu0 %1172, %v765_v23  }
  0x44   : > { %780 = vperm.xlu1 %1173, %v766_v24  }
  0x47   : > { %785 = vperm.xlu0 %1172, %v767_v25  }
  0xaa   : > { %v446_v27 = vpop.permute.xlu0 %445  ;;  %v436_v29 = vpop.permute.xlu1 %435 }
  0xae   : > { %v441_v33 = vpop.permute.xlu0 %440  ;;  %v431_v38 = vpop.permute.xlu1 %430 }
  0xb2   : > { %v555_v45 = vpop.permute.xlu0 %554 }
  0xb3   : > { %v656_v53 = vpop.permute.xlu1 %655 }
  0xb6   : > { %v651_v55 = vpop.permute.xlu0 %650 }
  0xb7   : > { %v646_v59 = vpop.permute.xlu1 %645 }
  0xba   : > { %v641_v0 = vpop.permute.xlu0 %640 }
  0xf8   : > { %v1085_v28 = vpop.f32.mrf.mxu0 }
  0xf9   : > { %v533_v35 = vadd.f32 %v1085_v28, %v436_v29 }
  0xfa   : > { %v527_v30 = vpop.f32.mrf.mxu0 }
  0xfb   : > { %v528_v39 = vadd.f32 %v527_v30, %v431_v38  ;;  %v547_v41 = vmax.f32 %v533_v35, 0.0 }
  0xfc   : > { %v1088_v31 = vpop.f32.mrf.mxu0 }
  0xfd   : > { %v543_v32 = vadd.f32 %v1088_v31, %v446_v27  ;;  %v546_v42 = vmax.f32 %v528_v39, 0.0 }
  0xfe   : > { %v537_v34 = vpop.f32.mrf.mxu0 }
  0xff   : > { %v549_v36 = vmax.f32 %v543_v32, 0.0  ;;  %v538_v37 = vadd.f32 %v537_v34, %v441_v33 }
 0x101   : > { %v548_v40 = vmax.f32 %v538_v37, 0.0  ;;  %1090 = vmatpush3.msra.mxu1 %v549_v36 }
 0x102   : > { %1091 = vmatprep.subr.mxu1 %v1267_v26 }
 0x103   : > { %1092 = vmatpush3.msra.mxu1 %v548_v40 }
 0x104   : > { %1093 = vmatprep.subr.mxu1 %v1267_v26 }
 0x105   : > { %1094 = vmatpush3.msra.mxu1 %v547_v41 }
 0x106   : > { %1095 = vmatprep.subr.mxu1 %v1267_v26 }
 0x107   : > { %1096 = vmatpush3.msra.mxu1 %v546_v42 }
 0x108   : > { %1098 = vmatmul.mubr.msk.f32.vlgmr.msra.gmra.mxu1 %vm448_vm0, %v550_v43 }
 0x109   : > { %1102 = vmatprep.mubr.msk.f32.mxu1 %vm658_vm2, %v630_v44 }
 0x1c8   : > { %v626_v46 = vpop.f32.mrf.mxu1 }
 0x1c9   : > { %v627_v47 = vadd.f32 %v626_v46, %v555_v45 }
 0x1ca   : > { %v1099_v48 = vpop.f32.mrf.mxu1 }
 0x1cb   : > { %1100 = vmatprep.subr.mxu1 %v627_v47  ;;  %885 = vst [vmem:[%s1461_s18] sm:$0xff] %v627_v47 }
 0x1cc   : > { %1101 = vmatpush3.msra.mxu1 %v627_v47 }
 0x1cd   : > { %1103 = vmatmul.mubr.msk.f32.vlgmr.msra.gmra.mxu1 %vm658_vm2, %v631_v49 }
 0x1ce   : > { %1105 = vmatprep.mubr.msk.f32.mxu1 %vm658_vm2, %v632_v50 }
 0x1d1   : > { %1106 = vmatmul.mubr.msk.f32.gmra.mxu1 %vm658_vm2, %v633_v51 }
 0x28d   : > { %v1104_v54 = vpop.f32.mrf.mxu1 }
 0x28e   : > { %v743_v61 = vadd.f32 %v1104_v54, %v646_v59 }
 0x28f   : > { %v737_v56 = vpop.f32.mrf.mxu1 }
 0x290   : > { %v738_v1 = vadd.f32 %v737_v56, %v641_v0  ;;  %v757_v3 = vmax.f32 %v743_v61, 0.0 }
 0x291   : > { %v1107_v57 = vpop.f32.mrf.mxu1 }
 0x292   : > { %v753_v58 = vadd.f32 %v1107_v57, %v656_v53  ;;  %v756_v4 = vmax.f32 %v738_v1, 0.0 }
 0x293   : > { %v747_v60 = vpop.f32.mrf.mxu1 }
 0x294   : > { %v759_v62 = vmax.f32 %v753_v58, 0.0  ;;  %v748_v63 = vadd.f32 %v747_v60, %v651_v55 }
 0x296   : > { %v758_v2 = vmax.f32 %v748_v63, 0.0  ;;  %1108 = vmatprep.subr.mxu0 %v759_v62 }
 0x297   : > { %1109 = vmatpush3.msra.mxu0 %v759_v62 }
 0x298   : > { %1110 = vmatprep.subr.mxu0 %v758_v2 }
 0x299   : > { %1111 = vmatpush3.msra.mxu0 %v758_v2 }
 0x29a   : > { %1112 = vmatprep.subr.mxu0 %v757_v3 }
 0x29b   : > { %1113 = vmatpush3.msra.mxu0 %v757_v3 }
 0x29c   : > { %1114 = vmatprep.subr.mxu0 %v756_v4 }
 0x29d   : > { %1115 = vmatpush3.msra.mxu0 %v756_v4 }
 0x29e   : > { %1117 = vmatmul.mubr.msk.f32.vlgmr.msra.gmra.mxu0 %vm448_vm0, %v761_v5 }
 0x29f   : > { %1119 = vmatprep.mubr.msk.f32.mxu0 %vm448_vm0, %v762_v6 }
 0x2a2   : > { %1120 = vmatmul.mubr.msk.f32.gmra.mxu0 %vm448_vm0, %v763_v7 }
 0x2a3   : > { %1187 = shalt.err (!%p1184_p5)
}
 0x2a4   : > { %s1188_s17 = scalar_lea.hbm %s907_s30, 128  ;;  %s1192_s28 = scalar_lea.hbm %s1568_s9, 256 }
 0x2a5   : > { %p1189_p7 = scmp.ne.s32.totalorder %s907_s30, %s1188_s17  ;;  %p1193_p12 = scmp.lt.s32.totalorder %s907_s30, %s1568_s9 }
 0x2a6   : > { %p1194_p13 = scmp.lt.s32.totalorder %s1192_s28, %s1188_s17 }
 0x2a7   : > { %p1190_p10 = pnand %p1189_p7, %p1367_p6 }
 0x2a8   : > { %p1195_p0 = por %p1194_p13, %p1193_p12 }
 0x2a9   : > { %p1191_p11 = pneg %p1190_p10 }
 0x2ab   : > { %p1196_p9 = pnand %p1195_p0, %p1191_p11 }
 0x2ad   : > { %1199 = shalt.err (!%p1196_p9)
}
 0x2ae   : > { %1122 = dma.vmem_to_hbm [thread:$0]  (%p1367_p6), %s910_s27, 128, %s907_s30, %s891_s11   ;;  %v776_v8 = vpop.permute.xlu0 %775  ;;  %v771_v9 = vpop.permute.xlu1 %770 }
 0x2af   : > { %s1580_s0 = sshll.u32 %s1386_s12, 5  ;;  %s1516_s27 = scalar_lea.hbm %s1569_s10, %s1488_s25 }
 0x2b0   : > { %s415_s21 = scalar_lea.vmem [#allocation5], %s1580_s0  ;;  %s896_s30 = scalar_lea.sflag [#allocation6], %s1386_s12 }
 0x2b1   : > { %s921_s20 = sshll.u32 %s415_s21, 4  ;;  %s1270_s29 = smov [#allocation5]   ;;  %s1510_s20 = int_to_ptr.vmem [resolvable:$true] %s921_s20 }
 0x2b2   : > { %v786_v14 = vpop.permute.xlu0 %785  ;;  %v781_v17 = vpop.permute.xlu1 %780  ;;  %s1200_s11 = scalar_lea.vmem %s1510_s20, 512  ;;  %s1204_s17 = sshll.u32 %s1270_s29, 4  ;;  %s1205_s17 = int_to_ptr.vmem [resolvable:$false] %s1204_s17 }
 0x2b3   : > { %p1201_p9 = scmp.ne.s32.totalorder %s1510_s20, %s1200_s11  ;;  %s1206_s18 = scalar_lea.vmem %s1205_s17, 1024 }
 0x2b4   : > { %p1207_p3 = scmp.lt.s32.totalorder %s1510_s20, %s1205_s17  ;;  %p1208_p4 = scmp.lt.s32.totalorder %s1206_s18, %s1200_s11 }
 0x2b5   : > { %p1202_p1 = pnand %p1201_p9, %p1367_p6 }
 0x2b6   : > { %p1209_p5 = por %p1208_p4, %p1207_p3 }
 0x2b7   : > { %p1203_p2 = pneg %p1202_p1 }
 0x2b9   : > { %p1210_p7 = pnand %p1209_p5, %p1203_p2 }
 0x35e   : > { %v1118_v10 = vpop.f32.mrf.mxu0 }
 0x35f   : > { %v872_v11 = vadd.f32 %v1118_v10, %v776_v8 }
 0x360   : > { %v866_v12 = vpop.f32.mrf.mxu0 }
 0x361   : > { %887 = vst [vmem:[%s415_s21 + $0x8] sm:$0xff] %v872_v11  ;;  %v867_v13 = vadd.f32 %v866_v12, %v771_v9 }
 0x362   : > { %v1121_v15 = vpop.f32.mrf.mxu0 }
 0x363   : > { %886 = vst [vmem:[%s415_s21] sm:$0xff] %v867_v13  ;;  %v882_v16 = vadd.f32 %v1121_v15, %v786_v14 }
 0x364   : > { %v876_v18 = vpop.f32.mrf.mxu0 }
 0x365   : > { %889 = vst [vmem:[%s415_s21 + $0x18] sm:$0xff] %v882_v16  ;;  %v877_v19 = vadd.f32 %v876_v18, %v781_v17 }
 0x367   : > { %888 = vst [vmem:[%s415_s21 + $0x10] sm:$0xff] %v877_v19 }
 0x368   : > { %1213 = shalt.err (!%p1210_p7)
}
 0x369   : > { %s1214_s25 = scalar_lea.hbm %s1516_s27, 512  ;;  %s1218_s0 = scalar_lea.hbm %s1569_s10, 1024 }
 0x36a   : > { %p1215_p10 = scmp.ne.s32.totalorder %s1516_s27, %s1214_s25  ;;  %p1219_p13 = scmp.lt.s32.totalorder %s1516_s27, %s1569_s10 }
 0x36b   : > { %p1220_p0 = scmp.lt.s32.totalorder %s1218_s0, %s1214_s25 }
 0x36c   : > { %p1216_p11 = pnand %p1215_p10, %p1367_p6 }
 0x36d   : > { %p1221_p9 = por %p1220_p0, %p1219_p13 }
 0x36e   : > { %p1217_p12 = pneg %p1216_p11 }
 0x370   : > { %p1222_p1 = pnand %p1221_p9, %p1217_p12 }
 0x372   : > { %1225 = shalt.err (!%p1222_p1)
}
 0x373   : > { %s1271_s2 = smov 128   ;;  %s1272_s11 = smov 256  }
 0x374   : > { %s1273_s29 = smov 8  }
 0x375   : > { %1123 = dma.vmem_to_hbm [thread:$0]  (%p1367_p6), %s1510_s20, 512, %s1516_s27, %s896_s30, %s1271_s2, %s1272_s11, %s1273_s29  }
 0x376 PF: > { %s936_s17 = sand.u32 1, %s1252_s13   ;;  %p1581_p2 = scmp.ge.s32.totalorder %s1264_s16, 2 }
 0x377   : > { %s937_s18 = scalar_lea.sflag [#allocation4], %s936_s17 }
 0x378   : > { %p1127_p3 = pnand %p1581_p2, %p1371_p8 }
 0x37a   : > { %p1128_p4 = pneg %p1127_p3 }
 0x37c   : > { %1243 = dma.done.wait (%p1128_p4), %s937_s18, 128  }
 0x37d   : > { %1245 = vsyncadd (%p1128_p4), %s937_s18, 4294967168  ;;  %s946_s25 = scalar_lea.sflag [#allocation6], %s936_s17 }
 0x37e   : > { %1247 = dma.done.wait (%p1128_p4), %s946_s25, 512  }
 0x37f   : > { %1249 = vsyncadd (%p1128_p4), %s946_s25, 4294966784  ;;  %p24_p6 = scmp.ge.s32.totalorder %s1352_s19, 4   ;;  %s1582_s13 = smov %s1256_s14 }
 0x380   : > { %s1583_s14 = smov %s1260_s15  ;;  %s1584_s15 = smov %s1365_s22 }
 0x381   : > { %s1585_s16 = smov %s1352_s19  ;;  %26 = sbr.rel (!%p24_p6) target bundleno = 9 (0x9), region = 151 }
 0x386   :  { %951 = vsyncpa [#allocation4], 1 }
 0x387   :  { %953 = vsyncpa [#allocation4 + $0x1], 1 }
 0x388   :  { %954 = vsyncpa [#allocation6], 1 }
 0x389   :  { %956 = vsyncpa [#allocation6 + $0x1], 1 }

</bundles_post_ra>
